<compile_context>
chip_gen: v5e
topology: v5e:2x2
jax: 0.10.0
libtpu: 0.0.40
codegen_flags: <defaults>
</compile_context>

<pallas_src>
import functools
import math

import jax
import jax.numpy as jnp
from jax.experimental import pallas as pl
from jax.experimental.pallas import tpu as pltpu

# ------------------------------- config (small) ------------------------------
CFG = dict(
    hidden_size=32,
    intermediate_size=64,
    num_attention_heads=4,
    num_key_value_heads=2,
    head_dim=16,
    rope_theta=10000.0,
    rms_norm_eps=1e-6,
    attention_bias=False,
)


# ----------------------------- fused layer kernel ----------------------------
def _decoder_layer_kernel(B, S, nh, nkv, hd, eps, scale,
                          x_ref, mask_ref, cos_ref, sina_ref, sinb_ref,
                          w_in_ref, wqkv_ref, wo_ref,
                          w_post_ref, wgu_ref, wd_ref, o_ref):
    """Whole decoder layer in one invocation; everything stays in VMEM/vregs."""
    n_rep = nh // nkv
    qdim = nh * hd
    kvdim = nkv * hd
    inter = wd_ref.shape[0]
    half = hd // 2
    M = B * S

    x = x_ref[...]                                   # (M, H) f32 residual stream

    # ---- GemmaRMSNorm (f32): x * rsqrt(mean(x^2)+eps) * (1 + w) ----
    def rmsnorm(v, w_row):
        var = jnp.mean(v * v, axis=-1, keepdims=True)
        return v * jax.lax.rsqrt(var + eps) * (1.0 + w_row)

    normed = rmsnorm(x, w_in_ref[...])               # (M, H)

    # ---- fused QKV projection: bf16 operands, f32 accumulation, M = B*S ----
    qkv = jnp.dot(normed.astype(jnp.bfloat16), wqkv_ref[...],
                  preferred_element_type=jnp.float32)        # (M, qdim+2*kvdim)

    # ---- RoPE on the full packed (lane-dense) qkv tensor ----
    # cos/sin arrive per token as (M, hd); broadcast across q+k heads here.
    # sin_a is nonzero only on second-half lanes of each head, sin_b (= -sin)
    # only on first-half lanes, so rotate_half is two rolls + three FMAs.
    cos_h = cos_ref[...]
    sa_h = sina_ref[...]
    sb_h = sinb_ref[...]
    ones_h = jnp.ones_like(cos_h)
    zeros_h = jnp.zeros_like(cos_h)
    cos_f = jnp.concatenate([cos_h] * (nh + nkv) + [ones_h] * nkv, axis=-1)
    sa_f = jnp.concatenate([sa_h] * (nh + nkv) + [zeros_h] * nkv, axis=-1)
    sb_f = jnp.concatenate([sb_h] * (nh + nkv) + [zeros_h] * nkv, axis=-1)
    # r_up[:, i] = qkv[:, i - half]   (used on second-half lanes)
    # r_dn[:, i] = qkv[:, i + half]   (used, negated via sb, on first-half lanes)
    r_up = jnp.roll(qkv, half, axis=1)
    r_dn = jnp.roll(qkv, -half, axis=1)
    qkv = qkv * cos_f + r_up * sa_f + r_dn * sb_f

    # split q/k/v in f32 (tile-aligned leading reshape, S == 8), then cast once.
    q3 = qkv[:, :qdim].reshape(B, S, qdim).astype(jnp.bfloat16)            # (B,S,nh*hd)
    k3 = qkv[:, qdim:qdim + kvdim].reshape(B, S, kvdim).astype(jnp.bfloat16)
    v3 = qkv[:, qdim + kvdim:].reshape(B, S, kvdim).astype(jnp.bfloat16)

    # ---- GQA attention: one batched contraction pair per KV group ----
    m = mask_ref[...]                                          # (B, S, S) additive
    m_rep = jnp.concatenate([m] * n_rep, axis=1)               # (B, n_rep*S, S)
    head_out = [None] * nh
    for g in range(nkv):                                       # tiny static loop
        # stack the n_rep query heads of KV group g along the row axis -> M=n_rep*S
        qg = jnp.concatenate(
            [q3[:, :, (g * n_rep + r) * hd:(g * n_rep + r + 1) * hd]
             for r in range(n_rep)], axis=1)                   # (B, n_rep*S, hd)
        kg = k3[:, :, g * hd:(g + 1) * hd]                     # (B, S, hd)
        vg = v3[:, :, g * hd:(g + 1) * hd]                     # (B, S, hd)
        s = jnp.einsum('bqd,bkd->bqk', qg, kg,
                       preferred_element_type=jnp.float32) * scale
        s = s + m_rep
        s = s - jnp.max(s, axis=-1, keepdims=True)
        p = jnp.exp(s)
        # plain divide kept for portability; pl.reciprocal(..., approx=True)
        # would route this to the EUP slot on hardware.
        p = p / jnp.sum(p, axis=-1, keepdims=True)             # f32 softmax
        og = jnp.einsum('bqk,bkd->bqd', p.astype(jnp.bfloat16), vg,
                        preferred_element_type=jnp.float32)    # (B, n_rep*S, hd)
        for r in range(n_rep):
            head_out[g * n_rep + r] = og[:, r * S:(r + 1) * S, :]
    attn = jnp.concatenate(head_out, axis=-1).reshape(M, qdim)  # packed (M, nh*hd)

    # ---- o-proj + residual ----
    h1 = x + jnp.dot(attn.astype(jnp.bfloat16), wo_ref[...],
                     preferred_element_type=jnp.float32)        # (M, H)

    # ---- post-attn RMSNorm + fused gate/up MLP + gelu(tanh) + down + residual ----
    normed2 = rmsnorm(h1, w_post_ref[...])
    gu = jnp.dot(normed2.astype(jnp.bfloat16), wgu_ref[...],
                 preferred_element_type=jnp.float32)            # (M, 2*I)
    gate = gu[:, :inter]
    up = gu[:, inter:]
    c0 = jnp.float32(math.sqrt(2.0 / math.pi))                  # gelu(approximate='tanh')
    act = 0.5 * gate * (1.0 + jnp.tanh(c0 * (gate + 0.044715 * gate * gate * gate)))
    mlp = jnp.dot((act * up).astype(jnp.bfloat16), wd_ref[...],
                  preferred_element_type=jnp.float32)           # (M, H)

    o_ref[...] = h1 + mlp


# ------------------------------- wrapper (jit) --------------------------------
def gemma_decoder_layer_forward(params, hidden_states, attention_mask, position_ids):
    cfg = CFG
    nh = cfg["num_attention_heads"]
    nkv = cfg["num_key_value_heads"]
    hd = cfg["head_dim"]
    eps = cfg["rms_norm_eps"]
    B, S, H = hidden_states.shape
    M = B * S

    # Fold batch into the matmul M dimension (layout plumbing only).
    x2d = jnp.asarray(hidden_states, jnp.float32).reshape(M, H)

    # GemmaRotaryEmbedding: per-token cos/sin (M, hd); heads broadcast in-kernel.
    inv_freq = 1.0 / (cfg["rope_theta"] **
                      (jnp.arange(0, hd, 2, dtype=jnp.float32) / hd))
    freqs = position_ids.astype(jnp.float32)[:, :, None] * inv_freq[None, None, :]
    emb = jnp.concatenate([freqs, freqs], axis=-1)              # (B, S, hd)
    cos = jnp.cos(emb).reshape(M, hd)
    sin = jnp.sin(emb).reshape(M, hd)
    # Pre-fold rotate_half's half-selection and sign into two sin masks.
    second = jnp.arange(hd) >= (hd // 2)
    sin_a = jnp.where(second[None, :], sin, 0.0)    # pairs with roll(+hd/2)
    sin_b = jnp.where(second[None, :], 0.0, -sin)   # pairs with roll(-hd/2)

    # HF-style additive mask, broadcast over heads -> (B, S, S).
    mask = jnp.asarray(attention_mask, jnp.float32).reshape(B, S, S)

    kernel = functools.partial(_decoder_layer_kernel, B, S, nh, nkv, hd, eps,
                               1.0 / math.sqrt(hd))

    # Grid-less call: every operand is a full-array VMEM block, copied once
    # (no double-buffering of grid-invariant weights).
    out2d = pl.pallas_call(
        kernel,
        out_shape=jax.ShapeDtypeStruct((M, H), jnp.float32),
        compiler_params=pltpu.CompilerParams(
            vmem_limit_bytes=64 * 1024 * 1024),
    )(x2d, mask, cos, sin_a, sin_b,
      params["input_norm"], params["wqkv"], params["wo"],
      params["post_norm"], params["wgu"], params["wd"])
    return out2d.reshape(B, S, H)


# ------------------------------ parameter init --------------------------------
def init_params(key, cfg):
    """Torch-convention (out,in) weights, fused / transposed / cast to bf16 ONCE."""
    H, inter = cfg["hidden_size"], cfg["intermediate_size"]
    nh, nkv, hd = cfg["num_attention_heads"], cfg["num_key_value_heads"], cfg["head_dim"]
    ks = jax.random.split(key, 7)

    def nrm(k, shape, scale=0.05):
        return scale * jax.random.normal(k, shape, jnp.float32)

    q_w = nrm(ks[0], (nh * hd, H))
    k_w = nrm(ks[1], (nkv * hd, H))
    v_w = nrm(ks[2], (nkv * hd, H))
    o_w = nrm(ks[3], (H, nh * hd))
    gate_w = nrm(ks[4], (inter, H))
    up_w = nrm(ks[5], (inter, H))
    down_w = nrm(ks[6], (H, inter))

    wdt = jnp.bfloat16   # bf16 MXU operands; f32 accumulation in-kernel
    return dict(
        # The reference GemmaRMSNorm initializes weight to ones and computes
        # x_hat * (1 + weight); keep the same convention for the test params.
        input_norm=jnp.ones((1, H), jnp.float32),
        post_norm=jnp.ones((1, H), jnp.float32),
        wqkv=jnp.concatenate([q_w, k_w, v_w], axis=0).T.astype(wdt),   # (H, nh*hd+2*nkv*hd)
        wo=o_w.T.astype(wdt),                                           # (nh*hd, H)
        wgu=jnp.concatenate([gate_w, up_w], axis=0).T.astype(wdt),      # (H, 2*I)
        wd=down_w.T.astype(wdt),                                        # (I, H)
    )


# ----------------------------------- main --------------------------------------
if __name__ == "__main__":
    key = jax.random.PRNGKey(0)
    kp, kh = jax.random.split(key)

    B, S = 2, 8
    H = CFG["hidden_size"]
    params = init_params(kp, CFG)

    hidden_states = 0.1 * jax.random.normal(kh, (B, S, H), jnp.float32)
    # HF-style additive causal mask (B, 1, S, S): 0 on/below diagonal, -1e9 above.
    causal = jnp.where(jnp.tril(jnp.ones((S, S), dtype=bool)), 0.0, -1e9)
    attention_mask = jnp.broadcast_to(causal.astype(jnp.float32), (B, 1, S, S))
    position_ids = jnp.broadcast_to(jnp.arange(S, dtype=jnp.int32), (B, S))

    fwd = jax.jit(gemma_decoder_layer_forward)
    out = fwd(params, hidden_states, attention_mask, position_ids)
    jax.block_until_ready(out)

    assert out.shape == (B, S, H)
    assert out.dtype == jnp.float32
    assert bool(jnp.all(jnp.isfinite(out)))
    print("KERNEL_OK")
</pallas_src>

<mosaic_0001>
module attributes {stable_mosaic.version = 11 : i64} {
  func.func @_decoder_layer_kernel(%arg0: memref<16x32xf32, #tpu.memory_space<vmem>>, %arg1: memref<2x8x8xf32, #tpu.memory_space<vmem>>, %arg2: memref<16x16xf32, #tpu.memory_space<vmem>>, %arg3: memref<16x16xf32, #tpu.memory_space<vmem>>, %arg4: memref<16x16xf32, #tpu.memory_space<vmem>>, %arg5: memref<1x32xf32, #tpu.memory_space<vmem>>, %arg6: memref<32x128xbf16, #tpu.memory_space<vmem>>, %arg7: memref<64x32xbf16, #tpu.memory_space<vmem>>, %arg8: memref<1x32xf32, #tpu.memory_space<vmem>>, %arg9: memref<32x128xbf16, #tpu.memory_space<vmem>>, %arg10: memref<64x32xbf16, #tpu.memory_space<vmem>>, %arg11: memref<16x32xf32, #tpu.memory_space<vmem>>) attributes {dimension_semantics = [], scalar_prefetch = 0 : i64, scratch_operands = 0 : i64, tpu.core_type = #tpu.core_type<tc>} {
    %c0 = arith.constant 0 : index
    %c0_0 = arith.constant 0 : index
    %0 = vector.load %arg0[%c0, %c0_0] : memref<16x32xf32, #tpu.memory_space<vmem>>, vector<16x32xf32>
    %c0_1 = arith.constant 0 : index
    %c0_2 = arith.constant 0 : index
    %1 = vector.load %arg5[%c0_1, %c0_2] : memref<1x32xf32, #tpu.memory_space<vmem>>, vector<1x32xf32>
    %2 = arith.mulf %0, %0 : vector<16x32xf32>
    %cst = arith.constant dense<0.000000e+00> : vector<16xf32>
    %3 = vector.multi_reduction <add>, %2, %cst [1] : vector<16x32xf32> to vector<16xf32>
    %4 = vector.shape_cast %3 : vector<16xf32> to vector<16x1xf32>
    %cst_3 = arith.constant 3.200000e+01 : f32
    %5 = vector.broadcast %cst_3 : f32 to vector<16x1xf32>
    %6 = arith.divf %4, %5 : vector<16x1xf32>
    %cst_4 = arith.constant 9.99999997E-7 : f32
    %7 = vector.broadcast %cst_4 : f32 to vector<16x1xf32>
    %8 = arith.addf %6, %7 : vector<16x1xf32>
    %9 = math.rsqrt %8 : vector<16x1xf32>
    %10 = vector.broadcast %9 : vector<16x1xf32> to vector<16x32xf32>
    %11 = arith.mulf %0, %10 : vector<16x32xf32>
    %cst_5 = arith.constant 1.000000e+00 : f32
    %12 = vector.broadcast %cst_5 : f32 to vector<1x32xf32>
    %13 = arith.addf %12, %1 : vector<1x32xf32>
    %14 = vector.broadcast %13 : vector<1x32xf32> to vector<16x32xf32>
    %15 = arith.mulf %11, %14 : vector<16x32xf32>
    %16 = arith.truncf %15 : vector<16x32xf32> to vector<16x32xbf16>
    %c0_6 = arith.constant 0 : index
    %c0_7 = arith.constant 0 : index
    %17 = vector.load %arg6[%c0_6, %c0_7] : memref<32x128xbf16, #tpu.memory_space<vmem>>, vector<32x128xbf16>
    %cst_8 = arith.constant dense<0.000000e+00> : vector<16x128xf32>
    %18 = tpu.matmul %16, %17, %cst_8 {dimension_numbers = #tpu.dot_dimension_numbers<[1], [0], [0], [1], [0, 0, 1, 1], [], []>} : vector<16x32xbf16>, vector<32x128xbf16>, vector<16x128xf32> -> vector<16x128xf32>
    %c0_9 = arith.constant 0 : index
    %c0_10 = arith.constant 0 : index
    %19 = vector.load %arg2[%c0_9, %c0_10] : memref<16x16xf32, #tpu.memory_space<vmem>>, vector<16x16xf32>
    %c0_11 = arith.constant 0 : index
    %c0_12 = arith.constant 0 : index
    %20 = vector.load %arg3[%c0_11, %c0_12] : memref<16x16xf32, #tpu.memory_space<vmem>>, vector<16x16xf32>
    %c0_13 = arith.constant 0 : index
    %c0_14 = arith.constant 0 : index
    %21 = vector.load %arg4[%c0_13, %c0_14] : memref<16x16xf32, #tpu.memory_space<vmem>>, vector<16x16xf32>
    %cst_15 = arith.constant 1.000000e+00 : f32
    %22 = vector.broadcast %cst_15 : f32 to vector<16x16xf32>
    %cst_16 = arith.constant 0.000000e+00 : f32
    %23 = vector.broadcast %cst_16 : f32 to vector<16x16xf32>
    %24 = tpu.concatenate %19, %19, %19, %19, %19, %19, %22, %22 in 1 : vector<16x16xf32>, vector<16x16xf32>, vector<16x16xf32>, vector<16x16xf32>, vector<16x16xf32>, vector<16x16xf32>, vector<16x16xf32>, vector<16x16xf32> -> vector<16x128xf32>
    %25 = tpu.concatenate %20, %20, %20, %20, %20, %20, %23, %23 in 1 : vector<16x16xf32>, vector<16x16xf32>, vector<16x16xf32>, vector<16x16xf32>, vector<16x16xf32>, vector<16x16xf32>, vector<16x16xf32>, vector<16x16xf32> -> vector<16x128xf32>
    %26 = tpu.concatenate %21, %21, %21, %21, %21, %21, %23, %23 in 1 : vector<16x16xf32>, vector<16x16xf32>, vector<16x16xf32>, vector<16x16xf32>, vector<16x16xf32>, vector<16x16xf32>, vector<16x16xf32>, vector<16x16xf32> -> vector<16x128xf32>
    %27 = vector.extract_strided_slice %18 {offsets = [0, 120], sizes = [16, 8], strides = [1, 1]} : vector<16x128xf32> to vector<16x8xf32>
    %28 = vector.extract_strided_slice %18 {offsets = [0, 0], sizes = [16, 120], strides = [1, 1]} : vector<16x128xf32> to vector<16x120xf32>
    %29 = tpu.concatenate %27, %28 in 1 : vector<16x8xf32>, vector<16x120xf32> -> vector<16x128xf32>
    %30 = vector.extract_strided_slice %18 {offsets = [0, 8], sizes = [16, 120], strides = [1, 1]} : vector<16x128xf32> to vector<16x120xf32>
    %31 = vector.extract_strided_slice %18 {offsets = [0, 0], sizes = [16, 8], strides = [1, 1]} : vector<16x128xf32> to vector<16x8xf32>
    %32 = tpu.concatenate %30, %31 in 1 : vector<16x120xf32>, vector<16x8xf32> -> vector<16x128xf32>
    %33 = arith.mulf %18, %24 : vector<16x128xf32>
    %34 = arith.mulf %29, %25 : vector<16x128xf32>
    %35 = arith.addf %33, %34 : vector<16x128xf32>
    %36 = arith.mulf %32, %26 : vector<16x128xf32>
    %37 = arith.addf %35, %36 : vector<16x128xf32>
    %38 = vector.extract_strided_slice %37 {offsets = [0, 0], sizes = [16, 64], strides = [1, 1]} : vector<16x128xf32> to vector<16x64xf32>
    %39 = vector.shape_cast %38 : vector<16x64xf32> to vector<2x8x64xf32>
    %40 = arith.truncf %39 : vector<2x8x64xf32> to vector<2x8x64xbf16>
    %41 = vector.extract_strided_slice %37 {offsets = [0, 64], sizes = [16, 32], strides = [1, 1]} : vector<16x128xf32> to vector<16x32xf32>
    %42 = vector.shape_cast %41 : vector<16x32xf32> to vector<2x8x32xf32>
    %43 = arith.truncf %42 : vector<2x8x32xf32> to vector<2x8x32xbf16>
    %44 = vector.extract_strided_slice %37 {offsets = [0, 96], sizes = [16, 32], strides = [1, 1]} : vector<16x128xf32> to vector<16x32xf32>
    %45 = vector.shape_cast %44 : vector<16x32xf32> to vector<2x8x32xf32>
    %46 = arith.truncf %45 : vector<2x8x32xf32> to vector<2x8x32xbf16>
    %c0_17 = arith.constant 0 : index
    %c0_18 = arith.constant 0 : index
    %c0_19 = arith.constant 0 : index
    %47 = vector.load %arg1[%c0_17, %c0_18, %c0_19] : memref<2x8x8xf32, #tpu.memory_space<vmem>>, vector<2x8x8xf32>
    %48 = tpu.concatenate %47, %47 in 1 : vector<2x8x8xf32>, vector<2x8x8xf32> -> vector<2x16x8xf32>
    %49 = vector.extract_strided_slice %40 {offsets = [0, 0, 0], sizes = [2, 8, 16], strides = [1, 1, 1]} : vector<2x8x64xbf16> to vector<2x8x16xbf16>
    %50 = vector.extract_strided_slice %40 {offsets = [0, 0, 16], sizes = [2, 8, 16], strides = [1, 1, 1]} : vector<2x8x64xbf16> to vector<2x8x16xbf16>
    %51 = tpu.concatenate %49, %50 in 1 : vector<2x8x16xbf16>, vector<2x8x16xbf16> -> vector<2x16x16xbf16>
    %52 = vector.extract_strided_slice %43 {offsets = [0, 0, 0], sizes = [2, 8, 16], strides = [1, 1, 1]} : vector<2x8x32xbf16> to vector<2x8x16xbf16>
    %53 = vector.extract_strided_slice %46 {offsets = [0, 0, 0], sizes = [2, 8, 16], strides = [1, 1, 1]} : vector<2x8x32xbf16> to vector<2x8x16xbf16>
    "tpu.trace_start"() <{level = 10 : i32, message = "bqd,bkd->bqk"}> : () -> ()
    %cst_20 = arith.constant dense<0.000000e+00> : vector<2x16x8xf32>
    %54 = tpu.matmul %51, %52, %cst_20 {dimension_numbers = #tpu.dot_dimension_numbers<[2], [2], [1], [1], [0, 0, 0, 1, 1, 1], [0], [0]>} : vector<2x16x16xbf16>, vector<2x8x16xbf16>, vector<2x16x8xf32> -> vector<2x16x8xf32>
    "tpu.trace_stop"() : () -> ()
    %cst_21 = arith.constant 2.500000e-01 : f32
    %55 = vector.broadcast %cst_21 : f32 to vector<2x16x8xf32>
    %56 = arith.mulf %54, %55 : vector<2x16x8xf32>
    %57 = arith.addf %56, %48 : vector<2x16x8xf32>
    %cst_22 = arith.constant dense<0xFF800000> : vector<2x16xf32>
    %58 = vector.multi_reduction <maximumf>, %57, %cst_22 [2] : vector<2x16x8xf32> to vector<2x16xf32>
    %59 = vector.shape_cast %58 : vector<2x16xf32> to vector<2x16x1xf32>
    %60 = vector.broadcast %59 : vector<2x16x1xf32> to vector<2x16x8xf32>
    %61 = arith.subf %57, %60 : vector<2x16x8xf32>
    %62 = math.exp %61 : vector<2x16x8xf32>
    %cst_23 = arith.constant dense<0.000000e+00> : vector<2x16xf32>
    %63 = vector.multi_reduction <add>, %62, %cst_23 [2] : vector<2x16x8xf32> to vector<2x16xf32>
    %64 = vector.shape_cast %63 : vector<2x16xf32> to vector<2x16x1xf32>
    %65 = vector.broadcast %64 : vector<2x16x1xf32> to vector<2x16x8xf32>
    %66 = arith.divf %62, %65 : vector<2x16x8xf32>
    %67 = arith.truncf %66 : vector<2x16x8xf32> to vector<2x16x8xbf16>
    "tpu.trace_start"() <{level = 10 : i32, message = "bqk,bkd->bqd"}> : () -> ()
    %cst_24 = arith.constant dense<0.000000e+00> : vector<2x16x16xf32>
    %68 = tpu.matmul %67, %53, %cst_24 {dimension_numbers = #tpu.dot_dimension_numbers<[2], [1], [1], [2], [0, 0, 0, 1, 1, 2], [0], [0]>} : vector<2x16x8xbf16>, vector<2x8x16xbf16>, vector<2x16x16xf32> -> vector<2x16x16xf32>
    "tpu.trace_stop"() : () -> ()
    %69 = vector.extract_strided_slice %68 {offsets = [0, 0, 0], sizes = [2, 8, 16], strides = [1, 1, 1]} : vector<2x16x16xf32> to vector<2x8x16xf32>
    %70 = vector.extract_strided_slice %68 {offsets = [0, 8, 0], sizes = [2, 8, 16], strides = [1, 1, 1]} : vector<2x16x16xf32> to vector<2x8x16xf32>
    %71 = vector.extract_strided_slice %40 {offsets = [0, 0, 32], sizes = [2, 8, 16], strides = [1, 1, 1]} : vector<2x8x64xbf16> to vector<2x8x16xbf16>
    %72 = vector.extract_strided_slice %40 {offsets = [0, 0, 48], sizes = [2, 8, 16], strides = [1, 1, 1]} : vector<2x8x64xbf16> to vector<2x8x16xbf16>
    %73 = tpu.concatenate %71, %72 in 1 : vector<2x8x16xbf16>, vector<2x8x16xbf16> -> vector<2x16x16xbf16>
    %74 = vector.extract_strided_slice %43 {offsets = [0, 0, 16], sizes = [2, 8, 16], strides = [1, 1, 1]} : vector<2x8x32xbf16> to vector<2x8x16xbf16>
    %75 = vector.extract_strided_slice %46 {offsets = [0, 0, 16], sizes = [2, 8, 16], strides = [1, 1, 1]} : vector<2x8x32xbf16> to vector<2x8x16xbf16>
    "tpu.trace_start"() <{level = 10 : i32, message = "bqd,bkd->bqk"}> : () -> ()
    %cst_25 = arith.constant dense<0.000000e+00> : vector<2x16x8xf32>
    %76 = tpu.matmul %73, %74, %cst_25 {dimension_numbers = #tpu.dot_dimension_numbers<[2], [2], [1], [1], [0, 0, 0, 1, 1, 1], [0], [0]>} : vector<2x16x16xbf16>, vector<2x8x16xbf16>, vector<2x16x8xf32> -> vector<2x16x8xf32>
    "tpu.trace_stop"() : () -> ()
    %cst_26 = arith.constant 2.500000e-01 : f32
    %77 = vector.broadcast %cst_26 : f32 to vector<2x16x8xf32>
    %78 = arith.mulf %76, %77 : vector<2x16x8xf32>
    %79 = arith.addf %78, %48 : vector<2x16x8xf32>
    %cst_27 = arith.constant dense<0xFF800000> : vector<2x16xf32>
    %80 = vector.multi_reduction <maximumf>, %79, %cst_27 [2] : vector<2x16x8xf32> to vector<2x16xf32>
    %81 = vector.shape_cast %80 : vector<2x16xf32> to vector<2x16x1xf32>
    %82 = vector.broadcast %81 : vector<2x16x1xf32> to vector<2x16x8xf32>
    %83 = arith.subf %79, %82 : vector<2x16x8xf32>
    %84 = math.exp %83 : vector<2x16x8xf32>
    %cst_28 = arith.constant dense<0.000000e+00> : vector<2x16xf32>
    %85 = vector.multi_reduction <add>, %84, %cst_28 [2] : vector<2x16x8xf32> to vector<2x16xf32>
    %86 = vector.shape_cast %85 : vector<2x16xf32> to vector<2x16x1xf32>
    %87 = vector.broadcast %86 : vector<2x16x1xf32> to vector<2x16x8xf32>
    %88 = arith.divf %84, %87 : vector<2x16x8xf32>
    %89 = arith.truncf %88 : vector<2x16x8xf32> to vector<2x16x8xbf16>
    "tpu.trace_start"() <{level = 10 : i32, message = "bqk,bkd->bqd"}> : () -> ()
    %cst_29 = arith.constant dense<0.000000e+00> : vector<2x16x16xf32>
    %90 = tpu.matmul %89, %75, %cst_29 {dimension_numbers = #tpu.dot_dimension_numbers<[2], [1], [1], [2], [0, 0, 0, 1, 1, 2], [0], [0]>} : vector<2x16x8xbf16>, vector<2x8x16xbf16>, vector<2x16x16xf32> -> vector<2x16x16xf32>
    "tpu.trace_stop"() : () -> ()
    %91 = vector.extract_strided_slice %90 {offsets = [0, 0, 0], sizes = [2, 8, 16], strides = [1, 1, 1]} : vector<2x16x16xf32> to vector<2x8x16xf32>
    %92 = vector.extract_strided_slice %90 {offsets = [0, 8, 0], sizes = [2, 8, 16], strides = [1, 1, 1]} : vector<2x16x16xf32> to vector<2x8x16xf32>
    %93 = tpu.concatenate %69, %70, %91, %92 in 2 : vector<2x8x16xf32>, vector<2x8x16xf32>, vector<2x8x16xf32>, vector<2x8x16xf32> -> vector<2x8x64xf32>
    %94 = vector.shape_cast %93 : vector<2x8x64xf32> to vector<16x64xf32>
    %95 = arith.truncf %94 : vector<16x64xf32> to vector<16x64xbf16>
    %c0_30 = arith.constant 0 : index
    %c0_31 = arith.constant 0 : index
    %96 = vector.load %arg7[%c0_30, %c0_31] : memref<64x32xbf16, #tpu.memory_space<vmem>>, vector<64x32xbf16>
    %cst_32 = arith.constant dense<0.000000e+00> : vector<16x32xf32>
    %97 = tpu.matmul %95, %96, %cst_32 {dimension_numbers = #tpu.dot_dimension_numbers<[1], [0], [0], [1], [0, 0, 1, 1], [], []>} : vector<16x64xbf16>, vector<64x32xbf16>, vector<16x32xf32> -> vector<16x32xf32>
    %98 = arith.addf %0, %97 : vector<16x32xf32>
    %c0_33 = arith.constant 0 : index
    %c0_34 = arith.constant 0 : index
    %99 = vector.load %arg8[%c0_33, %c0_34] : memref<1x32xf32, #tpu.memory_space<vmem>>, vector<1x32xf32>
    %100 = arith.mulf %98, %98 : vector<16x32xf32>
    %cst_35 = arith.constant dense<0.000000e+00> : vector<16xf32>
    %101 = vector.multi_reduction <add>, %100, %cst_35 [1] : vector<16x32xf32> to vector<16xf32>
    %102 = vector.shape_cast %101 : vector<16xf32> to vector<16x1xf32>
    %cst_36 = arith.constant 3.200000e+01 : f32
    %103 = vector.broadcast %cst_36 : f32 to vector<16x1xf32>
    %104 = arith.divf %102, %103 : vector<16x1xf32>
    %cst_37 = arith.constant 9.99999997E-7 : f32
    %105 = vector.broadcast %cst_37 : f32 to vector<16x1xf32>
    %106 = arith.addf %104, %105 : vector<16x1xf32>
    %107 = math.rsqrt %106 : vector<16x1xf32>
    %108 = vector.broadcast %107 : vector<16x1xf32> to vector<16x32xf32>
    %109 = arith.mulf %98, %108 : vector<16x32xf32>
    %cst_38 = arith.constant 1.000000e+00 : f32
    %110 = vector.broadcast %cst_38 : f32 to vector<1x32xf32>
    %111 = arith.addf %110, %99 : vector<1x32xf32>
    %112 = vector.broadcast %111 : vector<1x32xf32> to vector<16x32xf32>
    %113 = arith.mulf %109, %112 : vector<16x32xf32>
    %114 = arith.truncf %113 : vector<16x32xf32> to vector<16x32xbf16>
    %c0_39 = arith.constant 0 : index
    %c0_40 = arith.constant 0 : index
    %115 = vector.load %arg9[%c0_39, %c0_40] : memref<32x128xbf16, #tpu.memory_space<vmem>>, vector<32x128xbf16>
    %cst_41 = arith.constant dense<0.000000e+00> : vector<16x128xf32>
    %116 = tpu.matmul %114, %115, %cst_41 {dimension_numbers = #tpu.dot_dimension_numbers<[1], [0], [0], [1], [0, 0, 1, 1], [], []>} : vector<16x32xbf16>, vector<32x128xbf16>, vector<16x128xf32> -> vector<16x128xf32>
    %117 = vector.extract_strided_slice %116 {offsets = [0, 0], sizes = [16, 64], strides = [1, 1]} : vector<16x128xf32> to vector<16x64xf32>
    %118 = vector.extract_strided_slice %116 {offsets = [0, 64], sizes = [16, 64], strides = [1, 1]} : vector<16x128xf32> to vector<16x64xf32>
    %cst_42 = arith.constant 5.000000e-01 : f32
    %119 = vector.broadcast %cst_42 : f32 to vector<16x64xf32>
    %120 = arith.mulf %119, %117 : vector<16x64xf32>
    %cst_43 = arith.constant 4.471500e-02 : f32
    %121 = vector.broadcast %cst_43 : f32 to vector<16x64xf32>
    %122 = arith.mulf %121, %117 : vector<16x64xf32>
    %123 = arith.mulf %122, %117 : vector<16x64xf32>
    %124 = arith.mulf %123, %117 : vector<16x64xf32>
    %125 = arith.addf %117, %124 : vector<16x64xf32>
    %cst_44 = arith.constant 0.797884583 : f32
    %126 = vector.broadcast %cst_44 : f32 to vector<16x64xf32>
    %127 = arith.mulf %126, %125 : vector<16x64xf32>
    %128 = math.tanh %127 : vector<16x64xf32>
    %cst_45 = arith.constant 1.000000e+00 : f32
    %129 = vector.broadcast %cst_45 : f32 to vector<16x64xf32>
    %130 = arith.addf %129, %128 : vector<16x64xf32>
    %131 = arith.mulf %120, %130 : vector<16x64xf32>
    %132 = arith.mulf %131, %118 : vector<16x64xf32>
    %133 = arith.truncf %132 : vector<16x64xf32> to vector<16x64xbf16>
    %c0_46 = arith.constant 0 : index
    %c0_47 = arith.constant 0 : index
    %134 = vector.load %arg10[%c0_46, %c0_47] : memref<64x32xbf16, #tpu.memory_space<vmem>>, vector<64x32xbf16>
    %cst_48 = arith.constant dense<0.000000e+00> : vector<16x32xf32>
    %135 = tpu.matmul %133, %134, %cst_48 {dimension_numbers = #tpu.dot_dimension_numbers<[1], [0], [0], [1], [0, 0, 1, 1], [], []>} : vector<16x64xbf16>, vector<64x32xbf16>, vector<16x32xf32> -> vector<16x32xf32>
    %136 = arith.addf %98, %135 : vector<16x32xf32>
    %c0_49 = arith.constant 0 : index
    %c0_50 = arith.constant 0 : index
    %137 = vector.load %arg11[%c0_49, %c0_50] : memref<16x32xf32, #tpu.memory_space<vmem>>, vector<16x32xf32>
    tpu.vector_store %arg11[%c0_49, %c0_50], %136 {strides = array<i32>} : memref<16x32xf32, #tpu.memory_space<vmem>>, vector<16x32xf32>,
    return
  }
}

</mosaic_0001>

<bundles_post_ra>
// kernel: gemma_decoder_layer_forward.1
= control target key start
LH: loop header
LB: loop body
LE: loop exit
PB: predicated region body
PF: predicated region fallthrough
CT: control target
= control target key end

     0   :  { %vm45_vm0 = vcmask 261120   ;;  %s1167_s21 = smov 16   ;;  %s1628_s0 = inlined_call_operand.vmem [shape: f32[16,32], index: 0, kind: input, shape index: {}]   ;;  %s1629_s1 = inlined_call_operand.vmem [shape: f32[2,8,8], index: 1, kind: input, shape index: {}]   ;;  %s1630_s2 = inlined_call_operand.vmem [shape: f32[16,16], index: 2, kind: input, shape index: {}]   ;;  %s1631_s3 = inlined_call_operand.vmem [shape: f32[16,16], index: 3, kind: input, shape index: {}]   ;;  %s1632_s4 = inlined_call_operand.vmem [shape: f32[16,16], index: 4, kind: input, shape index: {}]   ;;  %s1633_s5 = inlined_call_operand.vmem [shape: f32[1,32], index: 5, kind: input, shape index: {}]   ;;  %s1634_s6 = inlined_call_operand.vmem [shape: bf16[32,128], index: 6, kind: input, shape index: {}]   ;;  %s1635_s7 = inlined_call_operand.vmem [shape: bf16[64,32], index: 7, kind: input, shape index: {}]   ;;  %s1636_s8 = inlined_call_operand.vmem [shape: f32[1,32], index: 8, kind: input, shape index: {}]   ;;  %s1637_s9 = inlined_call_operand.vmem [shape: bf16[32,128], index: 9, kind: input, shape index: {}]   ;;  %s1638_s10 = inlined_call_operand.vmem [shape: bf16[64,32], index: 10, kind: input, shape index: {}]   ;;  %s1639_s11 = inlined_call_operand.hbm [shape: f32[16,32], index: 11, kind: output, shape index: {}]  }
   0x1   :  { %v1242_v0 = vld [vmem:[%s1628_s0] sm:$0xff] }
   0x2   :  { %v1247_v1 = vld [vmem:[%s1630_s2] sm:$0xff]  ;;  %v43_v2 = vmul.f32 %v1242_v0, %v1242_v0 }
   0x3   :  { %133 = vrot.lane.b32.xlu1 %v1247_v1, %s1167_s21 }
   0x4   :  { %16 = vsyncpa [#allocation3], 0  ;;  %v1256_v3 = vld [vmem:[%s1628_s0 + $0x8] sm:$0xff]  ;;  %v46_v4 = vsel %vm45_vm0, %v43_v2, 0.0  ;;  %s1168_s26 = smov 32   ;;  %v1169_v8 = vmov 32.0  }
   0x5   :  { %47 = vadd.xlane.f32.xlu0 %v46_v4  ;;  %v44_v5 = vmul.f32 %v1256_v3, %v1256_v3  ;;  %v1264_v6 = vld [vmem:[%s1630_s2 + $0x8] sm:$0xff]  ;;  %1093 = vrcp.f32 %v1169_v8  ;;  %s1170_s2 = smov 48   ;;  %s1171_s29 = smov 64   ;;  %v1289_v15 = vld [vmem:[%s1632_s4] sm:$0xff]  ;;  %vm163_vm8 = vcmask 130048   ;;  %vm168_vm9 = vcmask 392192  }
   0x6   :  { %v1276_v10 = vld [vmem:[%s1631_s3 + $0x8] sm:$0xff]  ;;  %v1054_v18 = vld [vmem:[%s1634_s6] sm:$0xff]  ;;  %s1172_s19 = smov 80   ;;  %vm171_vm10 = vcmask 523264   ;;  %vm174_vm11 = vcmask 654336   ;;  %vm177_vm12 = vcmask 785408  }
   0x7   :  { %v49_v7 = vsel %vm45_vm0, %v44_v5, 0.0  ;;  %v1055_v16 = vld [vmem:[%s1634_s6 + $0x8] sm:$0xff]  ;;  %v1309_v22 = vld [vmem:[%s1631_s3] sm:$0xff]  ;;  %vm180_vm13 = vcmask 916480   ;;  %s1175_s23 = smov 112   ;;  %vm314_vm14 = vcmask 1043456  }
   0x8   :  { %117 = vmatpush.bf16.msra.mxu0 %v1055_v16  ;;  %185 = vrot.lane.b32.xlu2 %v1309_v22, %s1167_s21  ;;  %v42_v35 = vld [vmem:[%s1633_s5] sm:$0x1]  ;;  %v1334_v41 = vld [vmem:[%s1632_s4 + $0x8] sm:$0xff]  ;;  %s1173_s4 = smov 120   ;;  %s1174_s5 = smov 8   ;;  %vm283_vm15 = vcmask 64512  }
   0x9   :  { %v85_v37 = vadd.f32 1.0, %v42_v35  ;;  %s1176_s24 = smov 96   ;;  %s982_s30 = sshll.u32 %s1639_s11, 4  ;;  %s983_s30 = int_to_ptr.hbm [resolvable:$true] %s982_s30 }
   0xa   :  { %s1178_s13 = smov 128  }
   0xb   :  { %135 = vrot.lane.b32.xlu1 %v1264_v6, %s1167_s21  ;;  %v1094_v9 = vpop.eup %1093  ;;  %v87_v43 = vperm.slane %v85_v37, 0 }
   0xc   :  { %v53_v11 = vmul.f32 32.0, %v1094_v9  ;;  %vm57_vm1 = vweird.f32 %v1094_v9  ;;  %118 = vmatpush.bf16.msra.mxu0 %v1054_v18 }
   0xd   :  { %50 = vadd.xlane.f32.xlu0 %v49_v7 }
   0xe   :  { %v54_v12 = vsub.f32 1.0, %v53_v11 }
  0x10   :  { %v55_v13 = vmul.f32 %v1094_v9, %v54_v12  ;;  %187 = vrot.lane.b32.xlu2 %v1276_v10, %s1167_s21 }
  0x12   :  { %v56_v14 = vadd.f32 %v1094_v9, %v55_v13 }
  0x13   :  { %141 = vrot.lane.b32.xlu1 %v1264_v6, %s1168_s26 }
  0x14   :  { %v1298_v17 = vsel %vm57_vm1, %v1094_v9, %v56_v14 }
  0x18   :  { %191 = vrot.lane.b32.xlu2 %v1309_v22, %s1168_s26 }
  0x1b   :  { %193 = vrot.lane.b32.xlu1 %v1276_v10, %s1168_s26 }
  0x20   :  { %145 = vrot.lane.b32.xlu2 %v1247_v1, %s1170_s2 }
  0x21   :  { %139 = vrot.lane.b32.xlu0 %v1247_v1, %s1168_s26 }
  0x23   :  { %147 = vrot.lane.b32.xlu1 %v1264_v6, %s1170_s2 }
  0x28   :  { %197 = vrot.lane.b32.xlu2 %v1309_v22, %s1170_s2 }
  0x29   :  { %199 = vrot.lane.b32.xlu0 %v1276_v10, %s1170_s2 }
  0x2b   :  { %231 = vrot.lane.b32.xlu1 %v1289_v15, %s1167_s21 }
  0x30   :  { %233 = vrot.lane.b32.xlu2 %v1334_v41, %s1167_s21 }
  0x31   :  { %151 = vrot.lane.b32.xlu0 %v1247_v1, %s1171_s29 }
  0x33   :  { %153 = vrot.lane.b32.xlu1 %v1264_v6, %s1171_s29 }
  0x38   :  { %203 = vrot.lane.b32.xlu2 %v1309_v22, %s1171_s29 }
  0x39   :  { %205 = vrot.lane.b32.xlu0 %v1276_v10, %s1171_s29 }
  0x3b   :  { %237 = vrot.lane.b32.xlu1 %v1289_v15, %s1168_s26 }
  0x40   :  { %239 = vrot.lane.b32.xlu2 %v1334_v41, %s1168_s26 }
  0x41   :  { %157 = vrot.lane.b32.xlu0 %v1247_v1, %s1172_s19 }
  0x43   :  { %159 = vrot.lane.b32.xlu1 %v1264_v6, %s1172_s19 }
  0x48   :  { %209 = vrot.lane.b32.xlu2 %v1309_v22, %s1172_s19 }
  0x49   :  { %211 = vrot.lane.b32.xlu0 %v1276_v10, %s1172_s19 }
  0x4b   :  { %243 = vrot.lane.b32.xlu1 %v1289_v15, %s1170_s2 }
  0x50   :  { %245 = vrot.lane.b32.xlu2 %v1334_v41, %s1170_s2 }
  0x51   :  { %249 = vrot.lane.b32.xlu0 %v1289_v15, %s1171_s29 }
  0x53   :  { %251 = vrot.lane.b32.xlu1 %v1334_v41, %s1171_s29 }
  0x58   :  { %255 = vrot.lane.b32.xlu2 %v1289_v15, %s1172_s19 }
  0x59   :  { %257 = vrot.lane.b32.xlu0 %v1334_v41, %s1172_s19 }
  0x62   :  { %v186_v54 = vpop.permute.xlu2 %185 }
  0x6a   :  { %v188_v55 = vpop.permute.xlu2 %187 }
  0x6b   :  { %v216_v57 = vsel %vm163_vm8, %v1276_v10, %v188_v55 }
  0x72   :  { %v192_v62 = vpop.permute.xlu2 %191 }
  0x75   :  { %v134_v45 = vpop.permute.xlu1 %133 }
  0x78   :  { %v48_v19 = vpop.xlane.xlu0 %47 }
  0x79   :  { %v59_v20 = vmul.f32 %v1298_v17, %v48_v19 }
  0x7b   :  { %v61_v21 = vadd.f32 1e-06, %v59_v20 }
  0x7d   :  { %1095 = vrsqrt.f32 %v61_v21  ;;  %vm69_vm3 = vweird.f32 %v61_v21  ;;  %v136_v50 = vpop.permute.xlu1 %135 }
  0x7e   :  { %v165_v51 = vsel %vm163_vm8, %v1264_v6, %v136_v50 }
  0x80   :  { %v51_v23 = vpop.xlane.xlu0 %50 }
  0x81   :  { %v60_v24 = vmul.f32 %v1298_v17, %v51_v23 }
  0x83   :  { %v1096_v25 = vpop.eup %1095  ;;  %v62_v26 = vadd.f32 1e-06, %v60_v24 }
  0x84   :  { %v64_v27 = vmul.f32 %v1096_v25, %v61_v21  ;;  %vm70_vm2 = vweird.f32 %v1096_v25 }
  0x85   :  { %1097 = vrsqrt.f32 %v62_v26  ;;  %vm71_vm4 = vmor %vm69_vm3, %vm70_vm2  ;;  %vm79_vm6 = vweird.f32 %v62_v26  ;;  %v142_v52 = vpop.permute.xlu1 %141 }
  0x86   :  { %v65_v28 = vmul.f32 %v1096_v25, %v64_v27  ;;  %v167_v53 = vsel %vm45_vm0, %v165_v51, %v142_v52 }
  0x88   :  { %v66_v29 = vmul.f32 0.5, %v65_v28 }
  0x8a   :  { %v67_v30 = vsub.f32 1.5, %v66_v29 }
  0x8b   :  { %v1098_v31 = vpop.eup %1097 }
  0x8c   :  { %v74_v32 = vmul.f32 %v1098_v31, %v62_v26  ;;  %v68_v33 = vmul.f32 %v1096_v25, %v67_v30  ;;  %vm80_vm5 = vweird.f32 %v1098_v31 }
  0x8d   :  { %vm81_vm7 = vmor %vm79_vm6, %vm80_vm5  ;;  %v194_v56 = vpop.permute.xlu1 %193 }
  0x8e   :  { %v75_v34 = vmul.f32 %v1098_v31, %v74_v32  ;;  %v72_v38 = vsel %vm71_vm4, %v1096_v25, %v68_v33  ;;  %v218_v58 = vsel %vm45_vm0, %v216_v57, %v194_v56 }
  0x8f   :  { %v83_v42 = vmul.f32 %v72_v38, %v1242_v0  ;;  %v164_v0 = vsel %vm163_vm8, %v1247_v1, %v134_v45 }
  0x90   :  { %v76_v36 = vmul.f32 0.5, %v75_v34 }
  0x91   :  { %v89_v47 = vmul.f32 %v87_v43, %v83_v42 }
  0x92   :  { %v77_v39 = vsub.f32 1.5, %v76_v36  ;;  %v215_v36 = vsel %vm163_vm8, %v1309_v22, %v186_v54 }
  0x93   :  { %v140_v59 = vpop.permute.xlu0 %139 }
  0x94   :  { %v78_v40 = vmul.f32 %v1098_v31, %v77_v39  ;;  %v166_v2 = vsel %vm45_vm0, %v164_v0, %v140_v59 }
  0x95   :  { %v148_v14 = vpop.permute.xlu1 %147 }
  0x96   :  { %v82_v44 = vsel %vm81_vm7, %v1098_v31, %v78_v40  ;;  %v170_v25 = vsel %vm168_vm9, %v167_v53, %v148_v14 }
  0x97   :  { %v84_v46 = vmul.f32 %v82_v44, %v1256_v3  ;;  %v146_v3 = vpop.permute.xlu2 %145  ;;  %v217_v44 = vsel %vm45_vm0, %v215_v36, %v192_v62 }
  0x98   :  { %v169_v4 = vsel %vm168_vm9, %v166_v2, %v146_v3 }
  0x99   :  { %v90_v48 = vmul.f32 %v87_v43, %v84_v46 }
  0x9b   :  { %v91_v49 = vpack.c.bf16 %v90_v48, %v89_v47  ;;  %v200_v60 = vpop.permute.xlu0 %199 }
  0x9c   :  { %v220_v26 = vsel %vm168_vm9, %v218_v58, %v200_v60 }
  0x9d   :  { %1002 = vmatmul.msk.bf16.vlgmr.msra.gmra.mxu0 %vm45_vm0, %v91_v49  ;;  %v232_v18 = vpop.permute.xlu1 %231 }
  0x9e   :  { %v261_v40 = vsel %vm163_vm8, %v1289_v15, %v232_v18 }
  0x9f   :  { %v198_v12 = vpop.permute.xlu2 %197 }
  0xa0   :  { %v219_v49 = vsel %vm168_vm9, %v217_v44, %v198_v12 }
  0xa3   :  { %v152_v61 = vpop.permute.xlu0 %151 }
  0xa4   :  { %v172_v5 = vsel %vm171_vm10, %v169_v4, %v152_v61 }
  0xa5   :  { %v154_v20 = vpop.permute.xlu1 %153 }
  0xa6   :  { %v173_v27 = vsel %vm171_vm10, %v170_v25, %v154_v20 }
  0xa7   :  { %v234_v13 = vpop.permute.xlu2 %233 }
  0xa8   :  { %v262_v22 = vsel %vm163_vm8, %v1334_v41, %v234_v13 }
  0xab   :  { %v206_v63 = vpop.permute.xlu0 %205 }
  0xac   :  { %v222_v30 = vsel %vm171_vm10, %v220_v26, %v206_v63 }
  0xad   :  { %v238_v23 = vpop.permute.xlu1 %237 }
  0xae   :  { %v263_v47 = vsel %vm45_vm0, %v261_v40, %v238_v23 }
  0xaf   :  { %v204_v16 = vpop.permute.xlu2 %203 }
  0xb0   :  { %v221_v51 = vsel %vm171_vm10, %v219_v49, %v204_v16 }
  0xb3   :  { %v158_v6 = vpop.permute.xlu0 %157 }
  0xb4   :  { %v175_v7 = vsel %vm174_vm11, %v172_v5, %v158_v6 }
  0xb5   :  { %v178_v8 = vsel %vm177_vm12, %v175_v7, 1.0  ;;  %v160_v28 = vpop.permute.xlu1 %159 }
  0xb6   :  { %v181_v9 = vsel %vm180_vm13, %v178_v8, 1.0  ;;  %v176_v31 = vsel %vm174_vm11, %v173_v27, %v160_v28 }
  0xb7   :  { %v240_v19 = vpop.permute.xlu2 %239  ;;  %v179_v34 = vsel %vm177_vm12, %v176_v31, 1.0 }
  0xb8   :  { %v182_v37 = vsel %vm180_vm13, %v179_v34, 1.0  ;;  %v264_v53 = vsel %vm45_vm0, %v262_v22, %v240_v19  ;;  %v302_v34 = vld [vmem:[%s1629_s1] sm:$0xff] }
  0xbb   :  { %v212_v29 = vpop.permute.xlu0 %211 }
  0xbc   :  { %v224_v33 = vsel %vm174_vm11, %v222_v30, %v212_v29 }
  0xbd   :  { %v226_v35 = vsel %vm177_vm12, %v224_v33, 0.0  ;;  %v244_v38 = vpop.permute.xlu1 %243 }
  0xbe   :  { %v228_v43 = vsel %vm180_vm13, %v226_v35, 0.0  ;;  %v265_v50 = vsel %vm168_vm9, %v263_v47, %v244_v38 }
  0xbf   :  { %v210_v21 = vpop.permute.xlu2 %209 }
  0xc0   :  { %v223_v55 = vsel %vm174_vm11, %v221_v51, %v210_v21 }
  0xc1   :  { %v225_v58 = vsel %vm177_vm12, %v223_v55, 0.0 }
  0xc2   :  { %v227_v60 = vsel %vm180_vm13, %v225_v58, 0.0 }
  0xc3   :  { %v250_v39 = vpop.permute.xlu0 %249 }
  0xc4   :  { %v267_v54 = vsel %vm171_vm10, %v265_v50, %v250_v39  ;;  %v303_v39 = vld [vmem:[%s1629_s1 + $0x8] sm:$0xff]  ;;  %s1177_s1 = smov [#allocation2]  }
  0xc5   :  { %v252_v15 = vpop.permute.xlu1 %251  ;;  %s980_s12 = sshll.u32 %s1177_s1, 4  ;;  %s981_s12 = int_to_ptr.vmem [resolvable:$true] %s980_s12 }
  0xc7   :  { %v246_v24 = vpop.permute.xlu2 %245 }
  0xc8   :  { %v266_v56 = vsel %vm168_vm9, %v264_v53, %v246_v24 }
  0xc9   :  { %v268_v41 = vsel %vm171_vm10, %v266_v56, %v252_v15 }
  0xcb   :  { %v258_v52 = vpop.permute.xlu0 %257 }
  0xcc   :  { %v270_v0 = vsel %vm174_vm11, %v268_v41, %v258_v52 }
  0xcd   :  { %v272_v6 = vsel %vm177_vm12, %v270_v0, 0.0 }
  0xcf   :  { %v256_v32 = vpop.permute.xlu2 %255 }
  0xd0   :  { %v269_v57 = vsel %vm174_vm11, %v267_v54, %v256_v32 }
  0xd1   :  { %v271_v59 = vsel %vm177_vm12, %v269_v57, 0.0 }
  0xd2   :  { %v273_v2 = vsel %vm180_vm13, %v271_v59, 0.0 }
 0x11a   :  { %v120_v1 = vpop.f32.mrf.mxu0 }
 0x11b   :  { %v290_v10 = vmul.f32 %v181_v9, %v120_v1  ;;  %284 = vrot.lane.b32.xlu0 %v120_v1, %s1173_s4  ;;  %277 = vrot.lane.b32.xlu1 %v120_v1, %s1174_s5  ;;  %v274_v9 = vsel %vm180_vm13, %v272_v6, 0.0 }
 0x122   :  { %v122_v11 = vpop.f32.mrf.mxu0 }
 0x123   :  { %286 = vrot.lane.b32.xlu1 %v122_v11, %s1173_s4  ;;  %279 = vrot.lane.b32.xlu2 %v122_v11, %s1174_s5  ;;  %v291_v45 = vmul.f32 %v182_v37, %v122_v11 }
 0x17d   :  { %v280_v42 = vpop.permute.xlu2 %279 }
 0x17e   :  { %v293_v46 = vmul.f32 %v280_v42, %v228_v43 }
 0x180   :  { %v295_v48 = vadd.f32 %v293_v46, %v291_v45 }
 0x18d   :  { %v278_v61 = vpop.permute.xlu1 %277  ;;  %v285_v62 = vpop.permute.xlu0 %284 }
 0x18e   :  { %v292_v63 = vmul.f32 %v278_v61, %v227_v60  ;;  %v296_v4 = vmul.f32 %v285_v62, %v273_v2 }
 0x190   :  { %v294_v3 = vadd.f32 %v292_v63, %v290_v10 }
 0x192   :  { %v298_v5 = vadd.f32 %v296_v4, %v294_v3 }
 0x194   :  { %v300_v7 = vpack.c.bf16 %v298_v5, %v298_v5 }
 0x195   :  { %v287_v8 = vpop.permute.xlu1 %286 }
 0x196   :  { %v306_v1 = vunpack.c.l.b16 %v300_v7  ;;  %v297_v11 = vmul.f32 %v287_v8, %v274_v9 }
 0x198   :  { %v1411_v12 = vpack.c.b16 %v306_v1, %v306_v1  ;;  %v299_v13 = vadd.f32 %v297_v11, %v295_v48 }
 0x19a   :  { %v301_v14 = vpack.c.bf16 %v299_v13, %v299_v13  ;;  %321 = vrot.lane.b32.xlu1 %v1411_v12, %s1171_s29  ;;  %310 = vrot.lane.b32.xlu2 %v1411_v12, %s1175_s23 }
 0x19c   :  { %v307_v10 = vunpack.c.l.b16 %v301_v14 }
 0x19e   :  { %v1416_v16 = vpack.c.b16 %v307_v10, %v307_v10 }
 0x1a0   :  { %312 = vrot.lane.b32.xlu0 %v1416_v16, %s1175_s23 }
 0x1a2   :  { %553 = vrot.lane.b32.xlu1 %v1416_v16, %s1170_s2  ;;  %342 = vrot.lane.b32.xlu2 %v1416_v16, %s1171_s29 }
 0x1a8   :  { %528 = vrot.lane.b32.xlu0 %v1411_v12, %s1170_s2 }
 0x1f4   :  { %v311_v18 = vpop.permute.xlu2 %310 }
 0x1f5   :  { %v317_v19 = vsel %vm314_vm14, %v300_v7, %v311_v18 }
 0x1f6   :  { %526 = vrot.lane.b32.xlu2 %v317_v19, %s1176_s24 }
 0x1fc   :  { %v343_v20 = vpop.permute.xlu2 %342 }
 0x1fd   :  { %v347_v21 = vsel %vm163_vm8, %v343_v20, 0 }
 0x1fe   :  { %356 = vmatpush.bf16.xpose.msra.mxu2 %v347_v21 }
 0x20c   :  { %v322_v23 = vpop.permute.xlu1 %321 }
 0x20d   :  { %v326_v24 = vsel %vm163_vm8, %v322_v23, 0 }
 0x20e   :  { %335 = vmatpush.bf16.xpose.msra.mxu1 %v326_v24 }
 0x212   :  { %v313_v25 = vpop.permute.xlu0 %312 }
 0x213   :  { %v320_v26 = vsel %vm314_vm14, %v301_v14, %v313_v25 }
 0x214   :  { %v554_v27 = vpop.permute.xlu1 %553  ;;  %551 = vrot.lane.b32.xlu0 %v320_v26, %s1176_s24  ;;  %1004 = vmatmul.msk.bf16.vlgmr.msra.gmra.mxu2 %vm163_vm8, %v320_v26 }
 0x215   :  { %1003 = vmatmul.msk.bf16.vlgmr.msra.gmra.mxu1 %vm163_vm8, %v317_v19  ;;  %v559_v28 = vsel %vm163_vm8, %v554_v27, 0 }
 0x216   :  { %568 = vmatpush.bf16.xpose.msrb.mxu1 %v559_v28 }
 0x21a   :  { %v529_v29 = vpop.permute.xlu0 %528 }
 0x21b   :  { %v534_v30 = vsel %vm163_vm8, %v529_v29, 0 }
 0x21c   :  { %543 = vmatpush.bf16.xpose.msrb.mxu0 %v534_v30 }
 0x250   :  { %v527_v31 = vpop.permute.xlu2 %526 }
 0x251   :  { %1007 = vmatmul.msk.bf16.vlgmr.msrb.gmra.mxu0 %vm163_vm8, %v527_v31 }
 0x286   :  { %v552_v32 = vpop.permute.xlu0 %551 }
 0x287   :  { %1008 = vmatmul.msk.bf16.vlgmr.msrb.gmra.mxu1 %vm163_vm8, %v552_v32 }
 0x292   :  { %v337_v33 = vpop.f32.mrf.mxu1 }
 0x293   :  { %v363_v35 = vmul.f32 0.25, %v337_v33 }
 0x295   :  { %v367_v36 = vadd.f32 %v363_v35, %v302_v34 }
 0x297   :  { %v358_v37 = vpop.f32.mrf.mxu2  ;;  %v371_v38 = vsel %vm283_vm15, %v367_v36, -inf }
 0x298   :  { %v365_v40 = vmul.f32 0.25, %v358_v37  ;;  %372 = vmax.xlane.f32.xlu1 %v371_v38 }
 0x29a   :  { %v339_v42 = vpop.f32.mrf.mxu1  ;;  %v369_v43 = vadd.f32 %v365_v40, %v303_v39 }
 0x29b   :  { %v364_v44 = vmul.f32 0.25, %v339_v42 }
 0x29c   :  { %v377_v45 = vsel %vm283_vm15, %v369_v43, -inf }
 0x29d   :  { %378 = vmax.xlane.f32.xlu0 %v377_v45  ;;  %v368_v46 = vadd.f32 %v364_v44, %v302_v34 }
 0x29f   :  { %v360_v47 = vpop.f32.mrf.mxu2  ;;  %v374_v48 = vsel %vm283_vm15, %v368_v46, -inf }
 0x2a0   :  { %v366_v49 = vmul.f32 0.25, %v360_v47  ;;  %375 = vmax.xlane.f32.xlu2 %v374_v48 }
 0x2a2   :  { %v370_v22 = vadd.f32 %v366_v49, %v303_v39 }
 0x2a4   :  { %v380_v50 = vsel %vm283_vm15, %v370_v22, -inf }
 0x2a8   :  { %381 = vmax.xlane.f32.xlu2 %v380_v50 }
 0x2ce   :  { %v545_v51 = vpop.f32.mrf.mxu0 }
 0x2cf   :  { %v575_v15 = vmul.f32 0.25, %v545_v51 }
 0x2d1   :  { %v579_v52 = vadd.f32 %v575_v15, %v302_v34 }
 0x2d3   :  { %v583_v53 = vsel %vm283_vm15, %v579_v52, -inf }
 0x2d4   :  { %584 = vmax.xlane.f32.xlu1 %v583_v53 }
 0x2d6   :  { %v547_v54 = vpop.f32.mrf.mxu0 }
 0x2d7   :  { %v576_v55 = vmul.f32 0.25, %v547_v54 }
 0x2d9   :  { %v580_v56 = vadd.f32 %v576_v55, %v302_v34 }
 0x2db   :  { %v586_v57 = vsel %vm283_vm15, %v580_v56, -inf }
 0x2dc   :  { %587 = vmax.xlane.f32.xlu0 %v586_v57 }
 0x304   :  { %v570_v58 = vpop.f32.mrf.mxu1 }
 0x305   :  { %v577_v41 = vmul.f32 0.25, %v570_v58 }
 0x307   :  { %v581_v59 = vadd.f32 %v577_v41, %v303_v39 }
 0x309   :  { %v589_v60 = vsel %vm283_vm15, %v581_v59, -inf }
 0x30a   :  { %590 = vmax.xlane.f32.xlu2 %v589_v60 }
 0x30b   :  { %v373_v61 = vpop.xlane.xlu1 %372 }
 0x30c   :  { %v383_v62 = vsub.f32 %v367_v36, %v373_v61  ;;  %v572_v63 = vpop.f32.mrf.mxu1 }
 0x30d   :  { %v578_v0 = vmul.f32 0.25, %v572_v63 }
 0x30e   :  { %v387_v2 = vmul.f32 1.442695, %v383_v62 }
 0x30f   :  { %v582_v3 = vadd.f32 %v578_v0, %v303_v39 }
 0x310   :  { %1099 = vpow2.f32 %v387_v2  ;;  %v379_v4 = vpop.xlane.xlu0 %378 }
 0x311   :  { %v385_v5 = vsub.f32 %v369_v43, %v379_v4  ;;  %v592_v6 = vsel %vm283_vm15, %v582_v3, -inf }
 0x312   :  { %593 = vmax.xlane.f32.xlu1 %v592_v6 }
 0x313   :  { %v391_v7 = vmul.f32 1.442695, %v385_v5  ;;  %v376_v8 = vpop.xlane.xlu2 %375 }
 0x314   :  { %v384_v9 = vsub.f32 %v368_v46, %v376_v8 }
 0x315   :  { %1101 = vpow2.f32 %v391_v7 }
 0x316   :  { %v1449_v1 = vpop.eup %1099  ;;  %v389_v11 = vmul.f32 1.442695, %v384_v9 }
 0x317   :  { %v395_v13 = vsel %vm283_vm15, %v1449_v1, 0.0 }
 0x318   :  { %1103 = vpow2.f32 %v389_v11  ;;  %396 = vadd.xlane.f32.xlu0 %v395_v13 }
 0x31b   :  { %v1453_v14 = vpop.eup %1101  ;;  %v382_v10 = vpop.xlane.xlu2 %381 }
 0x31c   :  { %v386_v18 = vsub.f32 %v370_v22, %v382_v10  ;;  %v401_v19 = vsel %vm283_vm15, %v1453_v14, 0.0 }
 0x31d   :  { %402 = vadd.xlane.f32.xlu1 %v401_v19 }
 0x31e   :  { %v1457_v20 = vpop.eup %1103  ;;  %v393_v21 = vmul.f32 1.442695, %v386_v18 }
 0x31f   :  { %v398_v23 = vsel %vm283_vm15, %v1457_v20, 0.0 }
 0x320   :  { %1105 = vpow2.f32 %v393_v21  ;;  %399 = vadd.xlane.f32.xlu2 %v398_v23 }
 0x326   :  { %v1461_v24 = vpop.eup %1105 }
 0x327   :  { %v404_v25 = vsel %vm283_vm15, %v1461_v24, 0.0 }
 0x328   :  { %405 = vadd.xlane.f32.xlu0 %v404_v25 }
 0x338   :  { %476 = vrot.lane.b32.xlu2 %v1411_v12, %s1168_s26 }
 0x340   :  { %715 = vrot.lane.b32.xlu2 %v1416_v16, %s1167_s21 }
 0x347   :  { %v585_v26 = vpop.xlane.xlu1 %584 }
 0x348   :  { %v595_v27 = vsub.f32 %v579_v52, %v585_v26 }
 0x34a   :  { %v599_v28 = vmul.f32 1.442695, %v595_v27 }
 0x34c   :  { %1107 = vpow2.f32 %v599_v28 }
 0x34f   :  { %v588_v29 = vpop.xlane.xlu0 %587 }
 0x350   :  { %v596_v30 = vsub.f32 %v580_v56, %v588_v29 }
 0x352   :  { %v1469_v31 = vpop.eup %1107  ;;  %v601_v32 = vmul.f32 1.442695, %v596_v30 }
 0x353   :  { %v607_v33 = vsel %vm283_vm15, %v1469_v31, 0.0 }
 0x354   :  { %1109 = vpow2.f32 %v601_v32  ;;  %608 = vadd.xlane.f32.xlu1 %v607_v33 }
 0x35a   :  { %v1473_v34 = vpop.eup %1109 }
 0x35b   :  { %v610_v35 = vsel %vm283_vm15, %v1473_v34, 0.0 }
 0x35c   :  { %611 = vadd.xlane.f32.xlu0 %v610_v35 }
 0x37d   :  { %v591_v36 = vpop.xlane.xlu2 %590 }
 0x37e   :  { %v597_v37 = vsub.f32 %v581_v59, %v591_v36 }
 0x380   :  { %v603_v38 = vmul.f32 1.442695, %v597_v37 }
 0x382   :  { %1111 = vpow2.f32 %v603_v38 }
 0x385   :  { %v594_v39 = vpop.xlane.xlu1 %593 }
 0x386   :  { %v598_v40 = vsub.f32 %v582_v3, %v594_v39 }
 0x388   :  { %v1477_v42 = vpop.eup %1111  ;;  %v605_v43 = vmul.f32 1.442695, %v598_v40 }
 0x389   :  { %v613_v44 = vsel %vm283_vm15, %v1477_v42, 0.0 }
 0x38a   :  { %1113 = vpow2.f32 %v605_v43  ;;  %614 = vadd.xlane.f32.xlu1 %v613_v44 }
 0x38b   :  { %v397_v45 = vpop.xlane.xlu0 %396 }
 0x38c   :  { %1115 = vrcp.f32 %v397_v45  ;;  %v418_v15 = vand.u32 2147483648, %v397_v45  ;;  %vm412_vm2 = vweird.f32 %v397_v45  ;;  %v416_v53 = vand.u32 2147483647, %v397_v45 }
 0x38e   :  { %v419_v58 = vor.u32 1.1754944e-38, %v418_v15  ;;  %vm417_vm4 = vcmp.eq.f32.partialorder %v416_v53, 8.507059e+37 }
 0x390   :  { %v1481_v46 = vpop.eup %1113  ;;  %v403_v10 = vpop.xlane.xlu1 %402 }
 0x391   :  { %v616_v48 = vsel %vm283_vm15, %v1481_v46, 0.0 }
 0x392   :  { %v1116_v47 = vpop.eup %1115  ;;  %617 = vadd.xlane.f32.xlu0 %v616_v48 }
 0x393   :  { %v408_v49 = vmul.f32 %v1116_v47, %v397_v45  ;;  %v400_v22 = vpop.xlane.xlu2 %399  ;;  %vm413_vm1 = vweird.f32 %v1116_v47  ;;  %v446_v45 = vand.u32 2147483647, %v403_v10 }
 0x394   :  { %1117 = vrcp.f32 %v400_v22  ;;  %vm414_vm3 = vmor %vm412_vm2, %vm413_vm1  ;;  %v433_v60 = vand.u32 2147483648, %v400_v22  ;;  %v431_v63 = vand.u32 2147483647, %v400_v22  ;;  %vm427_vm6 = vweird.f32 %v400_v22 }
 0x395   :  { %v409_v50 = vsub.f32 1.0, %v408_v49  ;;  %vm442_vm2 = vweird.f32 %v403_v10 }
 0x396   :  { %v434_v3 = vor.u32 1.1754944e-38, %v433_v60  ;;  %vm432_vm11 = vcmp.eq.f32.partialorder %v431_v63, 8.507059e+37 }
 0x397   :  { %v410_v51 = vmul.f32 %v1116_v47, %v409_v50 }
 0x399   :  { %v411_v52 = vadd.f32 %v1116_v47, %v410_v51 }
 0x39a   :  { %v1118_v54 = vpop.eup %1117 }
 0x39b   :  { %v423_v55 = vmul.f32 %v1118_v54, %v400_v22  ;;  %v477_v56 = vpop.permute.xlu2 %476  ;;  %v415_v57 = vsel %vm414_vm3, %v1116_v47, %v411_v52  ;;  %vm428_vm5 = vweird.f32 %v1118_v54  ;;  %v448_v47 = vand.u32 2147483648, %v403_v10 }
 0x39c   :  { %v482_v59 = vsel %vm314_vm14, %v477_v56, 0  ;;  %v420_v61 = vsel %vm417_vm4, %v419_v58, %v415_v57  ;;  %vm429_vm7 = vmor %vm427_vm6, %vm428_vm5 }
 0x39d   :  { %v424_v41 = vsub.f32 1.0, %v423_v55  ;;  %491 = vmatpush.bf16.msra.mxu3 %v482_v59  ;;  %v421_v2 = vmul.f32 %v1449_v1, %v420_v61  ;;  %v406_v1 = vpop.xlane.xlu0 %405  ;;  %v449_v57 = vor.u32 1.1754944e-38, %v448_v47 }
 0x39e   :  { %1119 = vrcp.f32 %v406_v1  ;;  %v461_v38 = vand.u32 2147483647, %v406_v1  ;;  %v463_v43 = vand.u32 2147483648, %v406_v1  ;;  %vm457_vm1 = vweird.f32 %v406_v1 }
 0x39f   :  { %v425_v62 = vmul.f32 %v1118_v54, %v424_v41  ;;  %v467_v7 = vpack.c.bf16 %v421_v2, %v421_v2  ;;  %1121 = vrcp.f32 %v403_v10 }
 0x3a0   :  { %vm462_vm5 = vcmp.eq.f32.partialorder %v461_v38, 8.507059e+37  ;;  %v464_v52 = vor.u32 1.1754944e-38, %v463_v43 }
 0x3a1   :  { %v426_v0 = vadd.f32 %v1118_v54, %v425_v62  ;;  %v473_v9 = vunpack.c.l.b16 %v467_v7 }
 0x3a3   :  { %503 = vrot.lane.b32.xlu1 %v1416_v16, %s1168_s26  ;;  %v430_v4 = vsel %vm429_vm7, %v1118_v54, %v426_v0 }
 0x3a4   :  { %v435_v5 = vsel %vm432_vm11, %v434_v3, %v430_v4  ;;  %v1120_v19 = vpop.eup %1119 }
 0x3a5   :  { %v436_v6 = vmul.f32 %v1457_v20, %v435_v5  ;;  %v1122_v20 = vpop.eup %1121  ;;  %v453_v21 = vmul.f32 %v1120_v19, %v406_v1  ;;  %vm458_vm12 = vweird.f32 %v1120_v19 }
 0x3a6   :  { %688 = vrot.lane.b32.xlu0 %v1411_v12, %s1167_s21  ;;  %v438_v23 = vmul.f32 %v1122_v20, %v403_v10  ;;  %vm443_vm13 = vweird.f32 %v1122_v20  ;;  %vm1500_vm3 = vmor %vm457_vm1, %vm458_vm12 }
 0x3a7   :  { %v468_v8 = vpack.c.bf16 %v436_v6, %v436_v6  ;;  %v454_v26 = vsub.f32 1.0, %v453_v21  ;;  %vm1506_vm4 = vmor %vm442_vm2, %vm443_vm13  ;;  %vm447_vm13 = vcmp.eq.f32.partialorder %v446_v45, 8.507059e+37 }
 0x3a8   :  { %v439_v28 = vsub.f32 1.0, %v438_v23 }
 0x3a9   :  { %v474_v11 = vunpack.c.l.b16 %v468_v8  ;;  %v455_v30 = vmul.f32 %v1120_v19, %v454_v26 }
 0x3aa   :  { %v440_v35 = vmul.f32 %v1122_v20, %v439_v28 }
 0x3ab   :  { %v475_v13 = vpack.c.b16 %v474_v11, %v473_v9  ;;  %v456_v37 = vadd.f32 %v1120_v19, %v455_v30 }
 0x3ac   :  { %v441_v40 = vadd.f32 %v1122_v20, %v440_v35 }
 0x3ad   :  { %1005 = vmatmul.msk.bf16.vlgmr.msra.gmra.mxu3 %vm283_vm15, %v475_v13  ;;  %v460_v50 = vsel %vm1500_vm3, %v1120_v19, %v456_v37 }
 0x3ae   :  { %v445_v15 = vsel %vm1506_vm4, %v1122_v20, %v441_v40  ;;  %v465_v58 = vsel %vm462_vm5, %v464_v52, %v460_v50 }
 0x3af   :  { %v450_v62 = vsel %vm447_vm13, %v449_v57, %v445_v15  ;;  %v466_v2 = vmul.f32 %v1461_v24, %v465_v58 }
 0x3b0   :  { %v451_v7 = vmul.f32 %v1453_v14, %v450_v62 }
 0x3b1   :  { %v470_v11 = vpack.c.bf16 %v466_v2, %v466_v2  ;;  %v1057_v2 = vld [vmem:[%s1635_s7 + $0x8] sm:$0xff] }
 0x3b3   :  { %v501_v20 = vunpack.c.l.b16 %v470_v11 }
 0x3c7   :  { %v1493_v16 = vpop.xlane.xlu1 %608 }
 0x3c8   :  { %v630_v41 = vand.u32 2147483648, %v1493_v16  ;;  %vm624_vm1 = vweird.f32 %v1493_v16  ;;  %v628_v60 = vand.u32 2147483647, %v1493_v16 }
 0x3ca   :  { %v631_v3 = vor.u32 1.1754944e-38, %v630_v41  ;;  %vm629_vm4 = vcmp.eq.f32.partialorder %v628_v60, 8.507059e+37 }
 0x3cf   :  { %v612_v18 = vpop.xlane.xlu0 %611 }
 0x3d0   :  { %1123 = vrcp.f32 %v612_v18  ;;  %v645_v53 = vand.u32 2147483648, %v612_v18  ;;  %vm639_vm11 = vweird.f32 %v612_v18  ;;  %v643_v56 = vand.u32 2147483647, %v612_v18 }
 0x3d1   :  { %1125 = vrcp.f32 %v1493_v16 }
 0x3d2   :  { %v646_v63 = vor.u32 1.1754944e-38, %v645_v53  ;;  %vm644_vm3 = vcmp.eq.f32.partialorder %v643_v56, 8.507059e+37 }
 0x3d6   :  { %v1124_v12 = vpop.eup %1123 }
 0x3d7   :  { %v1126_v25 = vpop.eup %1125  ;;  %v635_v27 = vmul.f32 %v1124_v12, %v612_v18  ;;  %vm640_vm6 = vweird.f32 %v1124_v12  ;;  %v469_v18 = vpack.c.bf16 %v451_v7, %v451_v7 }
 0x3d8   :  { %v620_v29 = vmul.f32 %v1126_v25, %v1493_v16  ;;  %vm625_vm7 = vweird.f32 %v1126_v25  ;;  %vm641_vm12 = vmor %vm639_vm11, %vm640_vm6 }
 0x3d9   :  { %v636_v32 = vsub.f32 1.0, %v635_v27  ;;  %vm626_vm2 = vmor %vm624_vm1, %vm625_vm7  ;;  %v500_v27 = vunpack.c.l.b16 %v469_v18 }
 0x3da   :  { %v621_v36 = vsub.f32 1.0, %v620_v29 }
 0x3db   :  { %v637_v39 = vmul.f32 %v1124_v12, %v636_v32 }
 0x3dc   :  { %v622_v44 = vmul.f32 %v1126_v25, %v621_v36  ;;  %v1060_v36 = vld [vmem:[%s1637_s9] sm:$0xff] }
 0x3dd   :  { %v638_v51 = vadd.f32 %v1124_v12, %v637_v39 }
 0x3de   :  { %v623_v55 = vadd.f32 %v1126_v25, %v622_v44 }
 0x3df   :  { %v642_v61 = vsel %vm641_vm12, %v1124_v12, %v638_v51  ;;  %v716_v12 = vpop.permute.xlu2 %715 }
 0x3e0   :  { %v627_v0 = vsel %vm626_vm2, %v1126_v25, %v623_v55  ;;  %v647_v4 = vsel %vm644_vm3, %v646_v63, %v642_v61  ;;  %v721_v35 = vsel %vm314_vm14, %v716_v12, 0  ;;  %v1059_v63 = vld [vmem:[%s1635_s7 + $0x18] sm:$0xff] }
 0x3e1   :  { %v632_v8 = vsel %vm629_vm4, %v631_v3, %v627_v0  ;;  %v648_v13 = vmul.f32 %v1473_v34, %v647_v4  ;;  %807 = vmatpush.bf16.msra.mxu0 %v1059_v63  ;;  %v1058_v0 = vld [vmem:[%s1635_s7 + $0x10] sm:$0xff]  ;;  %v1056_v3 = vld [vmem:[%s1635_s7] sm:$0xff]  ;;  %v1063_v63 = vld [vmem:[%s1638_s10 + $0x8] sm:$0xff] }
 0x3e2   :  { %v633_v16 = vmul.f32 %v1469_v31, %v632_v8 }
 0x3e3   :  { %v680_v21 = vpack.c.bf16 %v648_v13, %v648_v13 }
 0x3e4   :  { %v679_v28 = vpack.c.bf16 %v633_v16, %v633_v16 }
 0x3e5   :  { %v686_v39 = vunpack.c.l.b16 %v680_v21  ;;  %808 = vmatpush.bf16.msra.mxu0 %v1058_v0 }
 0x3e6   :  { %v685_v47 = vunpack.c.l.b16 %v679_v28 }
 0x3e8   :  { %v687_v50 = vpack.c.b16 %v686_v39, %v685_v47 }
 0x3e9   :  { %809 = vmatpush.bf16.msra.mxu0 %v1057_v2 }
 0x3ed   :  { %810 = vmatpush.bf16.msra.mxu0 %v1056_v3 }
 0x3fd   :  { %v1497_v33 = vpop.xlane.xlu1 %614 }
 0x3fe   :  { %1127 = vrcp.f32 %v1497_v33  ;;  %v660_v34 = vand.u32 2147483648, %v1497_v33  ;;  %vm654_vm12 = vweird.f32 %v1497_v33  ;;  %v658_v29 = vand.u32 2147483647, %v1497_v33 }
 0x400   :  { %v661_v40 = vor.u32 1.1754944e-38, %v660_v34  ;;  %vm659_vm2 = vcmp.eq.f32.partialorder %v658_v29, 8.507059e+37 }
 0x404   :  { %v1504_v49 = vpop.eup %1127 }
 0x405   :  { %v618_v54 = vpop.xlane.xlu0 %617  ;;  %v650_v59 = vmul.f32 %v1504_v49, %v1497_v33  ;;  %vm655_vm6 = vweird.f32 %v1504_v49  ;;  %v502_v33 = vpack.c.b16 %v501_v20, %v500_v27 }
 0x406   :  { %1129 = vrcp.f32 %v618_v54  ;;  %v675_v24 = vand.u32 2147483648, %v618_v54  ;;  %vm669_vm7 = vweird.f32 %v618_v54  ;;  %v673_v25 = vand.u32 2147483647, %v618_v54  ;;  %vm1540_vm13 = vmor %vm654_vm12, %vm655_vm6 }
 0x407   :  { %v651_v5 = vsub.f32 1.0, %v650_v59 }
 0x408   :  { %v676_v37 = vor.u32 1.1754944e-38, %v675_v24  ;;  %vm674_vm1 = vcmp.eq.f32.partialorder %v673_v25, 8.507059e+37 }
 0x409   :  { %v652_v1 = vmul.f32 %v1504_v49, %v651_v5 }
 0x40b   :  { %v653_v14 = vadd.f32 %v1504_v49, %v652_v1 }
 0x40c   :  { %v1130_v6 = vpop.eup %1129 }
 0x40d   :  { %v665_v9 = vmul.f32 %v1130_v6, %v618_v54  ;;  %vm670_vm5 = vweird.f32 %v1130_v6  ;;  %v657_v38 = vsel %vm1540_vm13, %v1504_v49, %v653_v14  ;;  %v1139_v14 = vld [vmem:[%s1628_s0] sm:$0xff] }
 0x40e   :  { %vm1528_vm11 = vmor %vm669_vm7, %vm670_vm5  ;;  %v662_v48 = vsel %vm659_vm2, %v661_v40, %v657_v38 }
 0x40f   :  { %v666_v10 = vsub.f32 1.0, %v665_v9  ;;  %v663_v49 = vmul.f32 %v1477_v42, %v662_v48 }
 0x411   :  { %v667_v19 = vmul.f32 %v1130_v6, %v666_v10  ;;  %v681_v15 = vpack.c.bf16 %v663_v49, %v663_v49 }
 0x413   :  { %v668_v23 = vadd.f32 %v1130_v6, %v667_v19  ;;  %v712_v53 = vunpack.c.l.b16 %v681_v15 }
 0x415   :  { %v504_v31 = vpop.permute.xlu1 %503  ;;  %v672_v30 = vsel %vm1528_vm11, %v1130_v6, %v668_v23 }
 0x416   :  { %v509_v32 = vsel %vm314_vm14, %v504_v31, 0  ;;  %v677_v43 = vsel %vm674_vm1, %v676_v37, %v672_v30  ;;  %v1140_v31 = vld [vmem:[%s1628_s0 + $0x8] sm:$0xff] }
 0x417   :  { %518 = vmatpush.bf16.msrb.mxu3 %v509_v32  ;;  %v678_v22 = vmul.f32 %v1481_v46, %v677_v43  ;;  %v1061_v30 = vld [vmem:[%s1637_s9 + $0x8] sm:$0xff] }
 0x418   :  { %v689_v44 = vpop.permute.xlu0 %688  ;;  %886 = vmatpush.bf16.msra.mxu1 %v1061_v30 }
 0x419   :  { %v694_v45 = vsel %vm314_vm14, %v689_v44, 0  ;;  %v682_v51 = vpack.c.bf16 %v678_v22, %v678_v22 }
 0x41a   :  { %1006 = vmatmul.msk.bf16.vlgmr.msrb.gmra.mxu3 %vm283_vm15, %v502_v33  ;;  %703 = vmatpush.bf16.msrb.mxu2 %v694_v45 }
 0x41b   :  { %730 = vmatpush.bf16.msra.mxu3 %v721_v35  ;;  %v713_v52 = vunpack.c.l.b16 %v682_v51 }
 0x41c   :  { %887 = vmatpush.bf16.msra.mxu1 %v1060_v36 }
 0x41d   :  { %1009 = vmatmul.msk.bf16.vlgmr.msrb.gmra.mxu2 %vm283_vm15, %v687_v50  ;;  %v714_v54 = vpack.c.b16 %v713_v52, %v712_v53  ;;  %v819_v50 = vld [vmem:[%s1636_s8] sm:$0x1] }
 0x41e   :  { %v854_v52 = vadd.f32 1.0, %v819_v50 }
 0x42a   :  { %1010 = vmatmul.msk.bf16.vlgmr.msra.gmra.mxu3 %vm283_vm15, %v714_v54 }
 0x430   :  { %v493_v55 = vpop.f32.mrf.mxu3 }
 0x438   :  { %v495_v56 = vpop.f32.mrf.mxu3 }
 0x49d   :  { %v520_v57 = vpop.f32.mrf.mxu3 }
 0x4a0   :  { %v705_v46 = vpop.f32.mrf.mxu2 }
 0x4a5   :  { %v522_v58 = vpop.f32.mrf.mxu3 }
 0x4a6   :  { %v1078_v41 = vpack.i.bf16 %v522_v58, %v495_v56 }
 0x4a8   :  { %1079 = vrot.lane.b32.xlu2 %v1078_v41, %s1167_s21  ;;  %v707_v42 = vpop.f32.mrf.mxu2 }
 0x4ad   :  { %v732_v59 = vpop.f32.mrf.mxu3 }
 0x4ae   :  { %v1083_v60 = vpack.i.bf16 %v732_v59, %v705_v46 }
 0x4b0   :  { %1084 = vrot.lane.b32.xlu2 %v1083_v60, %s1168_s26  ;;  %v1065_v60 = vld [vmem:[%s1638_s10 + $0x18] sm:$0xff] }
 0x4b1   :  { %962 = vmatpush.bf16.msra.mxu2 %v1065_v60 }
 0x4b5   :  { %v734_v61 = vpop.f32.mrf.mxu3 }
 0x4b6   :  { %v1088_v62 = vpack.i.bf16 %v734_v61, %v707_v42 }
 0x4b8   :  { %1089 = vrot.lane.b32.xlu0 %v1088_v62, %s1170_s2  ;;  %v1064_v62 = vld [vmem:[%s1638_s10 + $0x10] sm:$0xff] }
 0x4b9   :  { %963 = vmatpush.bf16.msra.mxu2 %v1064_v62 }
 0x4bd   :  { %964 = vmatpush.bf16.msra.mxu2 %v1063_v63 }
 0x502   :  { %v1080_v4 = vpop.permute.xlu2 %1079 }
 0x503   :  { %v1082_v6 = vunpack.i.h.bf16 %v1080_v4  ;;  %v1081_v7 = vunpack.i.l.bf16 %v1080_v4 }
 0x505   :  { %v762_v13 = vsel %vm163_vm8, %v520_v57, %v1082_v6  ;;  %v761_v1 = vsel %vm163_vm8, %v493_v55, %v1081_v7  ;;  %v856_v55 = vperm.slane %v854_v52, 0 }
 0x50a   :  { %v1085_v5 = vpop.permute.xlu2 %1084 }
 0x50b   :  { %v1087_v8 = vunpack.i.h.bf16 %v1085_v5  ;;  %v1086_v9 = vunpack.i.l.bf16 %v1085_v5  ;;  %v1062_v5 = vld [vmem:[%s1638_s10] sm:$0xff] }
 0x50c   :  { %965 = vmatpush.bf16.msra.mxu2 %v1062_v5 }
 0x50d   :  { %v764_v16 = vsel %vm45_vm0, %v762_v13, %v1087_v8  ;;  %v763_v19 = vsel %vm45_vm0, %v761_v1, %v1086_v9 }
 0x52a   :  { %v1090_v11 = vpop.permute.xlu0 %1089 }
 0x52b   :  { %v1092_v10 = vunpack.i.h.bf16 %v1090_v11  ;;  %v1091_v18 = vunpack.i.l.bf16 %v1090_v11 }
 0x52d   :  { %v766_v24 = vsel %vm168_vm9, %v764_v16, %v1092_v10  ;;  %v765_v20 = vsel %vm168_vm9, %v763_v19, %v1091_v18 }
 0x52e   :  { %v767_v21 = vpack.c.bf16 %v766_v24, %v765_v20 }
 0x530   :  { %1027 = vmatmul.msk.bf16.vlgmr.msra.gmra.mxu0 %vm171_vm10, %v767_v21 }
 0x5ad   :  { %v812_v12 = vpop.f32.mrf.mxu0 }
 0x5ae   :  { %v1578_v23 = vadd.f32 %v1139_v14, %v812_v12 }
 0x5b0   :  { %v820_v25 = vmul.f32 %v1578_v23, %v1578_v23 }
 0x5b2   :  { %v822_v34 = vsel %vm45_vm0, %v820_v25, 0.0 }
 0x5b3   :  { %823 = vadd.xlane.f32.xlu1 %v822_v34 }
 0x5b5   :  { %v814_v26 = vpop.f32.mrf.mxu0 }
 0x5b6   :  { %v1586_v27 = vadd.f32 %v1140_v31, %v814_v26 }
 0x5b8   :  { %v821_v28 = vmul.f32 %v1586_v27, %v1586_v27 }
 0x5ba   :  { %v825_v29 = vsel %vm45_vm0, %v821_v28, 0.0 }
 0x5bb   :  { %826 = vadd.xlane.f32.xlu2 %v825_v29 }
 0x626   :  { %v824_v32 = vpop.xlane.xlu1 %823 }
 0x627   :  { %v828_v35 = vmul.f32 %v824_v32, %v1298_v17 }
 0x629   :  { %v830_v37 = vadd.f32 1e-06, %v828_v35 }
 0x62b   :  { %1131 = vrsqrt.f32 %v830_v37  ;;  %vm838_vm9 = vweird.f32 %v830_v37 }
 0x62e   :  { %v827_v38 = vpop.xlane.xlu2 %826 }
 0x62f   :  { %v829_v33 = vmul.f32 %v827_v38, %v1298_v17 }
 0x631   :  { %v1132_v39 = vpop.eup %1131  ;;  %v831_v40 = vadd.f32 1e-06, %v829_v33 }
 0x632   :  { %v833_v43 = vmul.f32 %v1132_v39, %v830_v37  ;;  %vm839_vm8 = vweird.f32 %v1132_v39 }
 0x633   :  { %1133 = vrsqrt.f32 %v831_v40  ;;  %vm840_vm14 = vmor %vm838_vm9, %vm839_vm8  ;;  %vm848_vm3 = vweird.f32 %v831_v40 }
 0x634   :  { %v834_v44 = vmul.f32 %v1132_v39, %v833_v43 }
 0x636   :  { %v835_v45 = vmul.f32 0.5, %v834_v44 }
 0x638   :  { %v836_v47 = vsub.f32 1.5, %v835_v45 }
 0x639   :  { %v1134_v48 = vpop.eup %1133 }
 0x63a   :  { %v843_v22 = vmul.f32 %v1134_v48, %v831_v40  ;;  %v837_v49 = vmul.f32 %v1132_v39, %v836_v47  ;;  %vm849_vm15 = vweird.f32 %v1134_v48 }
 0x63b   :  { %vm850_vm4 = vmor %vm848_vm3, %vm849_vm15 }
 0x63c   :  { %v844_v51 = vmul.f32 %v1134_v48, %v843_v22  ;;  %v841_v17 = vsel %vm840_vm14, %v1132_v39, %v837_v49 }
 0x63d   :  { %v852_v56 = vmul.f32 %v841_v17, %v1578_v23 }
 0x63e   :  { %v845_v15 = vmul.f32 0.5, %v844_v51 }
 0x63f   :  { %v858_v41 = vmul.f32 %v856_v55, %v852_v56 }
 0x640   :  { %v846_v53 = vsub.f32 1.5, %v845_v15 }
 0x642   :  { %v847_v54 = vmul.f32 %v1134_v48, %v846_v53 }
 0x644   :  { %v851_v57 = vsel %vm850_vm4, %v1134_v48, %v847_v54 }
 0x645   :  { %v853_v58 = vmul.f32 %v851_v57, %v1586_v27 }
 0x647   :  { %v859_v46 = vmul.f32 %v856_v55, %v853_v58 }
 0x649   :  { %v860_v59 = vpack.c.bf16 %v859_v46, %v858_v41 }
 0x64b   :  { %1036 = vmatmul.msk.bf16.vlgmr.msra.gmra.mxu1 %vm45_vm0, %v860_v59 }
 0x6c8   :  { %v889_v42 = vpop.f32.mrf.mxu1 }
 0x6c9   :  { %914 = vrot.lane.b32.xlu0 %v889_v42, %s1171_s29  ;;  %v896_v0 = vmul.f32 0.044715, %v889_v42  ;;  %v894_v24 = vmul.f32 0.5, %v889_v42 }
 0x6cb   :  { %v898_v3 = vmul.f32 %v896_v0, %v889_v42 }
 0x6cd   :  { %v900_v6 = vmul.f32 %v898_v3, %v889_v42 }
 0x6cf   :  { %v902_v8 = vadd.f32 %v900_v6, %v889_v42 }
 0x6d0   :  { %v891_v61 = vpop.f32.mrf.mxu1 }
 0x6d1   :  { %916 = vrot.lane.b32.xlu0 %v891_v61, %s1171_s29  ;;  %v897_v2 = vmul.f32 0.044715, %v891_v61  ;;  %v904_v11 = vmul.f32 0.7978846, %v902_v8  ;;  %v895_v20 = vmul.f32 0.5, %v891_v61 }
 0x6d3   :  { %v899_v4 = vmul.f32 %v897_v2, %v891_v61  ;;  %1135 = vtanh.f32 %v904_v11 }
 0x6d5   :  { %v901_v7 = vmul.f32 %v899_v4, %v891_v61 }
 0x6d7   :  { %v903_v9 = vadd.f32 %v901_v7, %v891_v61 }
 0x6d9   :  { %v905_v13 = vmul.f32 0.7978846, %v903_v9  ;;  %v1136_v1 = vpop.eup %1135 }
 0x6da   :  { %v908_v16 = vadd.f32 1.0, %v1136_v1 }
 0x6db   :  { %1137 = vtanh.f32 %v905_v13 }
 0x6dc   :  { %v910_v21 = vmul.f32 %v908_v16, %v894_v24 }
 0x6e1   :  { %v1138_v10 = vpop.eup %1137 }
 0x6e2   :  { %v909_v19 = vadd.f32 1.0, %v1138_v10 }
 0x6e4   :  { %v911_v12 = vmul.f32 %v909_v19, %v895_v20 }
 0x73b   :  { %v915_v18 = vpop.permute.xlu0 %914 }
 0x73c   :  { %v920_v25 = vmul.f32 %v915_v18, %v910_v21 }
 0x743   :  { %v917_v14 = vpop.permute.xlu0 %916 }
 0x744   :  { %v921_v34 = vmul.f32 %v917_v14, %v911_v12 }
 0x746   :  { %v922_v26 = vpack.c.bf16 %v921_v34, %v920_v25 }
 0x748   :  { %1053 = vmatmul.msk.bf16.vlgmr.msra.gmra.mxu2 %vm171_vm10, %v922_v26 }
 0x7cb   :  { %v967_v31 = vpop.f32.mrf.mxu2 }
 0x7cc   :  { %v972_v28 = vadd.f32 %v967_v31, %v1578_v23 }
 0x7ce   :  { %974 = vst.msk [vmem:[#allocation2] sm:$0xff] %vm45_vm0, %v972_v28 }
 0x7d3   :  { %v969_v29 = vpop.f32.mrf.mxu2 }
 0x7d4   :  { %v973_v30 = vadd.f32 %v969_v29, %v1586_v27 }
 0x7d6   :  { %975 = vst.msk [vmem:[#allocation2 + $0x8] sm:$0xff] %vm45_vm0, %v973_v30 }
 0x7d7   :  { %988 = dma.vmem_to_hbm [thread:$0]  %s981_s12, 256, %s983_s30, [#allocation3], %s1178_s13, %s1178_s13, %s1174_s5  }
 0x7d8   :  { %1165 = dma.done.wait [#allocation3], 256  }
 0x7d9   :  { %1166 = vsyncadd [#allocation3], 4294967040 }
 0x7da   :  { %993 = vsyncpa [#allocation3], 1 }

</bundles_post_ra>
